<compile_context>
chip_gen: v7x
topology: tpu7x:2x2x1
jax: 0.10.0
libtpu: 0.0.40
codegen_flags: <defaults>
</compile_context>

<pallas_src>
import functools

import jax
import jax.numpy as jnp
from jax import lax
from jax.experimental import pallas as pl
from jax.experimental.pallas import tpu as pltpu

_LANE = 128     # vreg lane width
_SUBLANE = 8    # f32 sublane count


def _encoder_kernel(x_ref, w_ref, b_ref, o_ref, *, l_relu: bool, slope: float):
    # x_ref: (TN, emb_dim)       VMEM  row tile of the batch
    # w_ref: (bneck_p, emb_dim)  VMEM  weight in PyTorch layout (grid-resident)
    # b_ref: (1, bneck_p)        VMEM  bias (grid-resident)
    # o_ref: (TN, bneck_p)       VMEM  lane-dense output tile
    #
    # Contract on the weight's *last* dim -> no transpose anywhere; the MXU
    # handles either operand orientation.
    y = lax.dot_general(
        x_ref[...],
        w_ref[...],
        dimension_numbers=(((1,), (1,)), ((), ())),
        preferred_element_type=jnp.float32,
    )
    y = y + b_ref[...]                       # broadcast (1, bneck_p) over rows
    if l_relu:
        y = jnp.where(y >= 0, y, slope * y)  # LeakyReLU(0.2); free under DMA slack
    o_ref[...] = y.astype(o_ref.dtype)


def encoder_forward(x, weight, bias, *, l_relu: int = 1, block_rows: int = 512):
    """MUSE Encoder forward.

    x:      (N, emb_dim)             f32
    weight: (bottleneck_dim, emb_dim) f32  -- PyTorch nn.Linear layout (NOT transposed)
    bias:   (bottleneck_dim,)         f32
    Returns (N, bottleneck_dim) f32.
    """
    n, emb_dim = x.shape
    bneck = weight.shape[0]

    # ---- lane-dense output: pad bottleneck dim to a multiple of 128 ----------
    bneck_p = pl.cdiv(bneck, _LANE) * _LANE
    if bneck_p != bneck:
        weight_p = jnp.pad(weight, ((0, bneck_p - bneck), (0, 0)))
        bias_p = jnp.pad(bias, (0, bneck_p - bneck))
    else:
        weight_p, bias_p = weight, bias
    bias2 = bias_p.reshape(1, bneck_p)

    # ---- row tiling over the batch dim (sublane-aligned, ragged tail padded) --
    # Per-step VMEM ~= 2*(TN*emb_dim + TN*bneck_p)*4B + weight; TN=512 stays well
    # under v7x's 32 MiB scoped VMEM for typical emb_dim (re-derive if huge).
    if n >= block_rows:
        tn = block_rows
    else:
        tn = max(_SUBLANE, pl.cdiv(n, _SUBLANE) * _SUBLANE)
    n_pad = pl.cdiv(n, tn) * tn
    x_p = jnp.pad(x, ((0, n_pad - n), (0, 0))) if n_pad != n else x
    grid = (n_pad // tn,)

    kernel = functools.partial(_encoder_kernel, l_relu=bool(l_relu == 1), slope=0.2)

    cost = pl.CostEstimate(
        flops=2 * n_pad * emb_dim * bneck_p,
        transcendentals=0,
        bytes_accessed=4 * (n_pad * emb_dim + bneck_p * emb_dim + n_pad * bneck_p),
    )

    out = pl.pallas_call(
        kernel,
        out_shape=jax.ShapeDtypeStruct((n_pad, bneck_p), jnp.float32),
        grid_spec=pltpu.PrefetchScalarGridSpec(
            num_scalar_prefetch=0,
            grid=grid,
            in_specs=[
                pl.BlockSpec((tn, emb_dim), lambda i: (i, 0)),        # batch-tiled x
                pl.BlockSpec((bneck_p, emb_dim), lambda i: (0, 0)),   # resident weight
                pl.BlockSpec((1, bneck_p), lambda i: (0, 0)),         # resident bias
            ],
            out_specs=pl.BlockSpec((tn, bneck_p), lambda i: (i, 0)),
        ),
        compiler_params=pltpu.CompilerParams(
            # batch tiles are independent -> shard across TensorCores (v7x megacore)
            dimension_semantics=("parallel",),
        ),
        cost_estimate=cost,
    )(x_p, weight_p, bias2)

    # Strip row padding and lane padding (padded cols are exact zeros+bias, unused).
    return out[:n, :bneck]
    # TODO(synk): for bf16 deployments on v6e/v7x, cast x/weight to bf16 at the
    # wrapper (keep f32 MXU accumulation) to halve HBM traffic.


if __name__ == "__main__":
    # Small shapes consistent with the module: batch=8, emb_dim=32, bottleneck=16.
    N, EMB_DIM, BNECK = 8, 32, 16
    L_RELU = 1

    key = jax.random.PRNGKey(0)
    kx, kw, kb = jax.random.split(key, 3)

    x = jax.random.normal(kx, (N, EMB_DIM), dtype=jnp.float32)
    # Deterministic synthetic params matching nn.Linear(emb_dim, bottleneck_dim).
    bound = 1.0 / (EMB_DIM ** 0.5)
    weight = jax.random.uniform(kw, (BNECK, EMB_DIM), jnp.float32, -bound, bound)
    bias = jax.random.uniform(kb, (BNECK,), jnp.float32, -bound, bound)

    out = encoder_forward(x, weight, bias, l_relu=L_RELU)
    out = jax.block_until_ready(out)

    # Reference check in plain JAX (same semantics as the PyTorch forward).
    ref = x @ weight.T + bias
    if L_RELU == 1:
        ref = jnp.where(ref >= 0, ref, 0.2 * ref)
    assert out.shape == ref.shape, (out.shape, ref.shape)
    assert jnp.allclose(out, ref, atol=1e-5, rtol=1e-5), "mismatch vs reference"

    print("KERNEL_OK")
</pallas_src>

<mosaic_0001>
module attributes {stable_mosaic.version = 11 : i64} {
  func.func @_encoder_kernel(%arg0: i32, %arg1: memref<8x32xf32, #tpu.memory_space<vmem>>, %arg2: memref<128x32xf32, #tpu.memory_space<vmem>>, %arg3: memref<1x128xf32, #tpu.memory_space<vmem>>, %arg4: memref<8x128xf32, #tpu.memory_space<vmem>>) attributes {dimension_semantics = [#tpu.dimension_semantics<parallel>], iteration_bounds = array<i64: 1>, scalar_prefetch = 0 : i64, scratch_operands = 0 : i64, tpu.core_type = #tpu.core_type<tc>, window_params = [{transform_indices = @transform_0, window_bounds = array<i64: 8, 32>}, {pipeline_mode = #tpu.pipeline_mode<synchronous>, transform_indices = @transform_1, window_bounds = array<i64: 128, 32>}, {pipeline_mode = #tpu.pipeline_mode<synchronous>, transform_indices = @transform_2, window_bounds = array<i64: 1, 128>}, {transform_indices = @transform_3, window_bounds = array<i64: 8, 128>}]} {
    %c0 = arith.constant 0 : index
    %c0_0 = arith.constant 0 : index
    %0 = vector.load %arg1[%c0, %c0_0] : memref<8x32xf32, #tpu.memory_space<vmem>>, vector<8x32xf32>
    %c0_1 = arith.constant 0 : index
    %c0_2 = arith.constant 0 : index
    %1 = vector.load %arg2[%c0_1, %c0_2] : memref<128x32xf32, #tpu.memory_space<vmem>>, vector<128x32xf32>
    %cst = arith.constant dense<0.000000e+00> : vector<8x128xf32>
    %2 = tpu.matmul %0, %1, %cst {dimension_numbers = #tpu.dot_dimension_numbers<[1], [1], [0], [0], [0, 0, 1, 0], [], []>} : vector<8x32xf32>, vector<128x32xf32>, vector<8x128xf32> -> vector<8x128xf32>
    %c0_3 = arith.constant 0 : index
    %c0_4 = arith.constant 0 : index
    %3 = vector.load %arg3[%c0_3, %c0_4] : memref<1x128xf32, #tpu.memory_space<vmem>>, vector<1x128xf32>
    %4 = vector.broadcast %3 : vector<1x128xf32> to vector<8x128xf32>
    %5 = arith.addf %2, %4 : vector<8x128xf32>
    %cst_5 = arith.constant 0.000000e+00 : f32
    %6 = vector.broadcast %cst_5 : f32 to vector<8x128xf32>
    %7 = arith.cmpf oge, %5, %6 : vector<8x128xf32>
    %cst_6 = arith.constant 2.000000e-01 : f32
    %8 = vector.broadcast %cst_6 : f32 to vector<8x128xf32>
    %9 = arith.mulf %8, %5 : vector<8x128xf32>
    %10 = arith.select %7, %5, %9 : vector<8x128xi1>, vector<8x128xf32>
    %c0_7 = arith.constant 0 : index
    %c0_8 = arith.constant 0 : index
    %11 = vector.load %arg4[%c0_7, %c0_8] : memref<8x128xf32, #tpu.memory_space<vmem>>, vector<8x128xf32>
    tpu.vector_store %arg4[%c0_7, %c0_8], %10 {strides = array<i32>} : memref<8x128xf32, #tpu.memory_space<vmem>>, vector<8x128xf32>,
    return
  }
  func.func @transform_0(%arg0: i32) -> (i32, i32) {
    %c0_i32 = arith.constant 0 : i32
    %c0_i32_0 = arith.constant 0 : i32
    return %arg0, %c0_i32 : i32, i32
  }
  func.func @transform_1(%arg0: i32) -> (i32, i32) {
    %c0_i32 = arith.constant 0 : i32
    %c0_i32_0 = arith.constant 0 : i32
    %c0_i32_1 = arith.constant 0 : i32
    return %c0_i32, %c0_i32_0 : i32, i32
  }
  func.func @transform_2(%arg0: i32) -> (i32, i32) {
    %c0_i32 = arith.constant 0 : i32
    %c0_i32_0 = arith.constant 0 : i32
    %c0_i32_1 = arith.constant 0 : i32
    return %c0_i32, %c0_i32_0 : i32, i32
  }
  func.func @transform_3(%arg0: i32) -> (i32, i32) {
    %c0_i32 = arith.constant 0 : i32
    %c0_i32_0 = arith.constant 0 : i32
    return %arg0, %c0_i32 : i32, i32
  }
}

</mosaic_0001>

<bundles_post_ra>
// kernel: tpu_custom_call.1
= control target key start
LH: loop header
LB: loop body
LE: loop exit
PB: predicated region body
PF: predicated region fallthrough
CT: control target
= control target key end

     0   :  { %vm39_vm0 = vcmask 261120   ;;  %v309_v2 = vmov 0.0|0.0   ;;  %vm310_vm2 = vmmov 0   ;;  %v311_v5 = vmov 0.0   ;;  %s422_s0 = inlined_call_operand.vmem [shape: f32[8,32], index: 0, kind: input, shape index: {}]   ;;  %s423_s1 = inlined_call_operand.vmem [shape: f32[128,32], index: 1, kind: input, shape index: {}]   ;;  %s424_s2 = inlined_call_operand.vmem [shape: f32[1,128], index: 2, kind: input, shape index: {}]   ;;  %s425_s3 = inlined_call_operand.hbm [shape: f32[8,128], index: 3, kind: output, shape index: {}]  }
   0x1   :  { %v16_v0 = vld [vmem:[%s423_s1] sm:$0xff]  ;;  %v17_v1 = vld [vmem:[%s423_s1 + $0x8] sm:$0xff]  ;;  %249 = vmatprep.subr.bf16.mxu0 %v309_v2  ;;  %vm341_vm1 = vmpackc.low %vm39_vm0, %vm39_vm0  ;;  %246 = vmatprep.mubr.msk.f32.mxu0 %vm310_vm2, %v311_v5 }
   0x2   :  { %v250_v3 = vpack.c.bf16 %v17_v1, %v16_v0  ;;  %v18_v6 = vld [vmem:[%s423_s1 + $0x10] sm:$0xff]  ;;  %v19_v7 = vld [vmem:[%s423_s1 + $0x18] sm:$0xff] }
   0x4   :  { %252 = vmatpush3.bf16.xpose.msk.msra.mxu0 %vm341_vm1, %v250_v3 }
   0x5   :  { %253 = vmatprep.subr.bf16.mxu0 %v309_v2 }
   0x6   :  { %8 = vsyncpa [#allocation3], 0  ;;  %v254_v8 = vpack.c.bf16 %v19_v7, %v18_v6  ;;  %v20_v9 = vld [vmem:[%s423_s1 + $0x20] sm:$0xff]  ;;  %v21_v10 = vld [vmem:[%s423_s1 + $0x28] sm:$0xff]  ;;  %s312_s21 = smov [#allocation2]  }
   0x7   :  { %v258_v11 = vpack.c.bf16 %v21_v10, %v20_v9  ;;  %v22_v12 = vld [vmem:[%s423_s1 + $0x30] sm:$0xff]  ;;  %v23_v13 = vld [vmem:[%s423_s1 + $0x38] sm:$0xff]  ;;  %v24_v15 = vld [vmem:[%s423_s1 + $0x40] sm:$0xff]  ;;  %s171_s22 = sshll.u32 %s312_s21, 4  ;;  %s172_s22 = int_to_ptr.vmem [resolvable:$true] %s171_s22 }
   0x8   :  { %v262_v14 = vpack.c.bf16 %v23_v13, %v22_v12  ;;  %v25_v16 = vld [vmem:[%s423_s1 + $0x48] sm:$0xff]  ;;  %v26_v18 = vld [vmem:[%s423_s1 + $0x50] sm:$0xff]  ;;  %v27_v19 = vld [vmem:[%s423_s1 + $0x58] sm:$0xff]  ;;  %p290_p1 = scmp.lt.s32.totalorder %s172_s22, %s172_s22 }
   0x9   :  { %v266_v17 = vpack.c.bf16 %v25_v16, %v24_v15  ;;  %v270_v20 = vpack.c.bf16 %v27_v19, %v26_v18  ;;  %v28_v21 = vld [vmem:[%s423_s1 + $0x60] sm:$0xff]  ;;  %v29_v22 = vld [vmem:[%s423_s1 + $0x68] sm:$0xff]  ;;  %v30_v24 = vld [vmem:[%s423_s1 + $0x70] sm:$0xff] }
   0xa   :  { %v274_v23 = vpack.c.bf16 %v29_v22, %v28_v21  ;;  %v31_v25 = vld [vmem:[%s423_s1 + $0x78] sm:$0xff]  ;;  %v15_v27 = vld [vmem:[%s422_s0] sm:$0xff]  ;;  %s285_s1 = scalar_lea.vmem %s172_s22, 128 }
   0xb   :  { %v278_v26 = vpack.c.bf16 %v31_v25, %v30_v24  ;;  %v179_v28 = vld [vmem:[%s424_s2] ss:$0 sm:$0xff]  ;;  %p286_p0 = scmp.ne.s32.totalorder %s172_s22, %s285_s1  ;;  %p291_p2 = scmp.lt.s32.totalorder %s285_s1, %s285_s1 }
   0xc   :  { %256 = vmatpush3.bf16.xpose.msk.msra.mxu0 %vm341_vm1, %v254_v8 }
   0xd   :  { %257 = vmatprep.subr.bf16.mxu0 %v309_v2  ;;  %p292_p3 = por %p291_p2, %p290_p1 }
   0xf   :  { %p293_p4 = pnand %p292_p3, %p286_p0 }
  0x14   :  { %260 = vmatpush3.bf16.xpose.msk.msra.mxu0 %vm341_vm1, %v258_v11 }
  0x15   :  { %261 = vmatprep.subr.bf16.mxu0 %v309_v2 }
  0x1c   :  { %264 = vmatpush3.bf16.xpose.msk.msra.mxu0 %vm341_vm1, %v262_v14 }
  0x1d   :  { %265 = vmatprep.subr.bf16.mxu0 %v309_v2 }
  0x24   :  { %268 = vmatpush3.bf16.xpose.msk.msra.mxu0 %vm341_vm1, %v266_v17 }
  0x25   :  { %269 = vmatprep.subr.bf16.mxu0 %v309_v2 }
  0x2c   :  { %272 = vmatpush3.bf16.xpose.msk.msra.mxu0 %vm341_vm1, %v270_v20 }
  0x2d   :  { %273 = vmatprep.subr.bf16.mxu0 %v309_v2 }
  0x34   :  { %276 = vmatpush3.bf16.xpose.msk.msra.mxu0 %vm341_vm1, %v274_v23 }
  0x35   :  { %277 = vmatprep.subr.bf16.mxu0 %v309_v2 }
  0x3c   :  { %280 = vmatpush3.bf16.xpose.msk.msra.mxu0 %vm341_vm1, %v278_v26 }
  0x43   :  { %247 = vmatmul.mubr.msk.f32.vlgmr.msra.gmra.mrb[0].mxu0 %vm39_vm0, %v15_v27 }
 0x116   :  { %v157_v29 = vpop.f32.mrb[0].mxu0 }
 0x117   :  { %v158_v30 = vadd.f32 %v179_v28, %v157_v29  ;;  %v248_v31 = vpop.f32.mrb[1].mxu0 }
 0x119   :  { %v162_v32 = vmul.f32 0.2, %v158_v30  ;;  %vm161_vm3 = vcmp.ge.f32.partialorder %v158_v30, 0.0 }
 0x11b   :  { %v163_v33 = vsel %vm161_vm3, %v158_v30, %v162_v32 }
 0x11c   :  { %164 = vst [vmem:[#allocation2] sm:$0xff] %v163_v33 }
 0x11d   :  { %296 = shalt.err (!%p293_p4)
}
 0x11e   :  { %s297_s2 = scalar_lea.hbm %s425_s3, 128 }
 0x11f   :  { %p298_p5 = scmp.ne.s32.totalorder %s425_s3, %s297_s2  ;;  %p301_p6 = scmp.lt.u32.totalorder %s297_s2, %s425_s3 }
 0x121   :  { %p303_p7 = pnand %p301_p6, %p298_p5 }
 0x123   :  { %306 = shalt.err (!%p303_p7)
}
 0x124   :  { %174 = dma.vmem_to_hbm [thread:$0]  %s172_s22, 128, %s425_s3, [#allocation3]  }
 0x125   :  { %307 = dma.done.wait [#allocation3], 128  }
 0x126   :  { %308 = vsyncadd [#allocation3], 4294967168 }
 0x127   :  { %178 = vsyncpa [#allocation3], 1 }

</bundles_post_ra>
